<compile_context>
chip_gen: v6e
topology: v6e:2x2x1
jax: 0.10.0
libtpu: 0.0.40
codegen_flags: <defaults>
</compile_context>

<pallas_src>
import math
from functools import partial

import jax
import jax.numpy as jnp
from jax.experimental import pallas as pl
from jax.experimental.pallas import tpu as pltpu


def _mhsa_kernel(x_ref, w_ref, b_ref, o_ref, *,
                 n_heads, d_head, seqs_per_block, seq_len, scale, mxu_dtype):
    """One grid step: `seqs_per_block` full sequences, all heads batched.

    x_ref : (TB, N, d)            activations, native (token, embed) layout
    w_ref : (H, d_head, 3*d_head) dense per-head QKV weight (pre-transposed)
    b_ref : (H, 1, 3*d_head)      per-head QKV bias (f32)
    o_ref : (TB, N, d)            lane-dense output (trailing dim = d)
    """
    H, dh, TB, N = n_heads, d_head, seqs_per_block, seq_len
    d = H * dh
    M = TB * N

    # Cast MXU operands once (no-op for the f32 path), keep f32 accumulation.
    x = x_ref[...].astype(mxu_dtype).reshape(M, d)                  # (M, d)

    # Per-head activation stack: cheap static lane slices + leading-axis stack.
    # Heads are handled below by dot_general batch dims, not Python loops.
    xh = jnp.stack([x[:, h * dh:(h + 1) * dh] for h in range(H)], axis=0)

    # One head-batched MXU matmul for every head's Q, K and V; bias added once.
    qkv = jax.lax.dot_general(
        xh, w_ref[...],
        (((2,), (1,)), ((0,), (0,))),
        preferred_element_type=jnp.float32) + b_ref[...]            # (H, M, 3dh)

    # Re-batch to (head * sequence, N, ...) for per-sequence attention.
    qkv = qkv.reshape(H * TB, N, 3 * dh)

    q = qkv[:, :, 0 * dh:1 * dh] * scale       # scale in f32, before any cast
    k = qkv[:, :, 1 * dh:2 * dh]
    v = qkv[:, :, 2 * dh:3 * dh]

    # Batched q @ k^T over (head, sequence) without transposing k.
    scores = jax.lax.dot_general(
        q.astype(mxu_dtype), k.astype(mxu_dtype),
        (((2,), (2,)), ((0,), (0,))),
        preferred_element_type=jnp.float32)                         # (H*TB, N, N)

    # Softmax statistics in f32.
    m = jnp.max(scores, axis=-1, keepdims=True)
    e = jnp.exp(scores - m)
    denom = jnp.sum(e, axis=-1, keepdims=True)

    # PV matmul first, normalise after (N*d_head instead of N*N multiplies).
    pv = jax.lax.dot_general(
        e.astype(mxu_dtype), v.astype(mxu_dtype),
        (((2,), (1,)), ((0,), (0,))),
        preferred_element_type=jnp.float32)                         # (H*TB, N, dh)
    o = pv * pl.reciprocal(denom, approx=True)

    # torch.hstack over heads -> one lane-dense (TB, N, d) store.
    o_ref[...] = jnp.concatenate(
        [o[h * TB:(h + 1) * TB] for h in range(H)], axis=-1).astype(o_ref.dtype)


def _pack_qkv(params, w_dtype):
    """Dense per-head QKV params: (H, dh, 3*dh) weight and (H, 1, 3*dh) bias.

    Per-head PyTorch Linear weights are (out, in); transpose once so the kernel
    computes  s_h @ W_h + b_h  with a single head-batched dot_general (no
    zero-padded block-diagonal matrix, no in-kernel weight transpose).
    """
    def t(w):                                   # (H, dh, dh) -> (H, dh_in, dh_out)
        return jnp.swapaxes(w, -1, -2)

    w_qkv = jnp.concatenate(
        [t(params["qw"]), t(params["kw"]), t(params["vw"])],
        axis=-1).astype(w_dtype)                                   # (H, dh, 3dh)
    b_qkv = jnp.concatenate(
        [params["qb"], params["kb"], params["vb"]],
        axis=-1)[:, None, :].astype(jnp.float32)                   # (H, 1, 3dh)
    return w_qkv, b_qkv


_VMEM_BUDGET = 40 * 1024 * 1024   # conservative vs v7x's 64 MiB physical VMEM


def _vmem_bytes_estimate(tb, N, d, H, w_bytes, b_bytes, x_itemsize):
    """Rough per-grid-step VMEM footprint (double-buffered I/O + intermediates)."""
    f32 = 4
    io_blocks = 2 * (2 * tb * N * d * x_itemsize)       # x & o, double-buffered
    weights = 2 * (w_bytes + b_bytes)                   # small dense weights
    inter = (tb * N * d * f32 * (1 + 3 + 2)             # xh, qkv, pv + concat
             + 2 * H * tb * N * N * f32)                # scores + exp weights
    return io_blocks + weights + inter


def multi_head_self_attention(x, params, *, n_heads, seqs_per_block=None,
                              mxu_dtype=None):
    """x: (B, N, d). Semantics match MultiHeadSelfAttention.forward.

    mxu_dtype: dtype for MXU operands (e.g. jnp.bfloat16 on v6e/v7x); softmax
    math and accumulation stay in float32. Defaults to x.dtype.
    """
    B, N, d = x.shape
    assert d % n_heads == 0, "d must be divisible by n_heads"
    d_head = d // n_heads
    if mxu_dtype is None:
        mxu_dtype = x.dtype
    mxu_dtype = jnp.dtype(mxu_dtype)

    w_qkv, b_qkv = _pack_qkv(params, mxu_dtype)
    w_bytes = w_qkv.size * w_qkv.dtype.itemsize
    b_bytes = b_qkv.size * b_qkv.dtype.itemsize

    if seqs_per_block is None:
        # Stack sequences toward ~256 MXU rows, keep >= 2 parallel grid steps
        # (v7x: 2 TensorCores) when B >= 2, and stay inside the VMEM budget.
        seqs_per_block = max(1, min(pl.cdiv(256, N), B // 2 if B > 1 else 1))
        while seqs_per_block > 1 and _vmem_bytes_estimate(
                seqs_per_block, N, d, n_heads, w_bytes, b_bytes,
                x.dtype.itemsize) > _VMEM_BUDGET:
            seqs_per_block -= 1
    seqs_per_block = max(1, min(seqs_per_block, B))
    while B % seqs_per_block:
        seqs_per_block -= 1
    grid = (B // seqs_per_block,)

    est = _vmem_bytes_estimate(seqs_per_block, N, d, n_heads, w_bytes, b_bytes,
                               x.dtype.itemsize)
    # Raise the scoped-VMEM limit explicitly (v5e default is 16 MiB); stay well
    # below v7x's 64 MiB physical VMEM.
    vmem_limit = int(max(32 * 1024 * 1024, min(48 * 1024 * 1024, 2 * est)))

    kernel = partial(_mhsa_kernel, n_heads=n_heads, d_head=d_head,
                     seqs_per_block=seqs_per_block, seq_len=N,
                     scale=1.0 / math.sqrt(d_head), mxu_dtype=mxu_dtype)

    return pl.pallas_call(
        kernel,
        out_shape=jax.ShapeDtypeStruct((B, N, d), x.dtype),
        grid_spec=pltpu.PrefetchScalarGridSpec(
            num_scalar_prefetch=0,
            grid=grid,
            in_specs=[
                pl.BlockSpec((seqs_per_block, N, d), lambda i: (i, 0, 0)),
                # Dense per-head weights are ~n_heads x smaller than the old
                # block-diagonal (d, 3d) matrix, so (double-)buffering them is
                # cheap; constant index_map -> fetched once, kept resident.
                pl.BlockSpec((n_heads, d_head, 3 * d_head),
                             lambda i: (0, 0, 0)),
                pl.BlockSpec((n_heads, 1, 3 * d_head), lambda i: (0, 0, 0)),
            ],
            out_specs=pl.BlockSpec((seqs_per_block, N, d),
                                   lambda i: (i, 0, 0)),
        ),
        compiler_params=pltpu.CompilerParams(
            dimension_semantics=("parallel",),
            vmem_limit_bytes=vmem_limit),
    )(x, w_qkv, b_qkv)


def _reference(x, params, *, n_heads):
    """Pure-JAX reference replicating the PyTorch forward loop."""
    B, N, d = x.shape
    d_head = d // n_heads
    outs = []
    for b in range(B):
        seq = x[b]
        heads = []
        for h in range(n_heads):
            s = seq[:, h * d_head:(h + 1) * d_head]
            q = s @ params["qw"][h].T + params["qb"][h]
            k = s @ params["kw"][h].T + params["kb"][h]
            v = s @ params["vw"][h].T + params["vb"][h]
            a = jax.nn.softmax(q @ k.T / math.sqrt(d_head), axis=-1)
            heads.append(a @ v)
        outs.append(jnp.concatenate(heads, axis=-1))
    return jnp.stack(outs, axis=0)


if __name__ == "__main__":
    B, N, d, n_heads = 2, 8, 32, 2
    d_head = d // n_heads

    key = jax.random.PRNGKey(0)
    keys = jax.random.split(key, 8)

    x = jax.random.normal(keys[0], (B, N, d), dtype=jnp.float32)

    # Deterministic per-head Linear parameters (PyTorch (out, in) convention).
    init = 1.0 / math.sqrt(d_head)
    params = {
        "qw": jax.random.uniform(keys[1], (n_heads, d_head, d_head),
                                 minval=-init, maxval=init, dtype=jnp.float32),
        "qb": jax.random.uniform(keys[2], (n_heads, d_head),
                                 minval=-init, maxval=init, dtype=jnp.float32),
        "kw": jax.random.uniform(keys[3], (n_heads, d_head, d_head),
                                 minval=-init, maxval=init, dtype=jnp.float32),
        "kb": jax.random.uniform(keys[4], (n_heads, d_head),
                                 minval=-init, maxval=init, dtype=jnp.float32),
        "vw": jax.random.uniform(keys[5], (n_heads, d_head, d_head),
                                 minval=-init, maxval=init, dtype=jnp.float32),
        "vb": jax.random.uniform(keys[6], (n_heads, d_head),
                                 minval=-init, maxval=init, dtype=jnp.float32),
    }

    ref = _reference(x, params, n_heads=n_heads)

    # Full-precision MXU-operand path.
    out = multi_head_self_attention(x, params, n_heads=n_heads)
    out = jax.block_until_ready(out)
    assert out.shape == (B, N, d)
    # Tolerance accounts for the EUP approx-reciprocal in the softmax denom.
    assert jnp.allclose(out, ref, atol=2e-3, rtol=2e-3), "f32 mismatch vs ref"

    # bf16 MXU-operand path (recommended on v6e/v7x); softmax stays in f32.
    out_bf16 = multi_head_self_attention(x, params, n_heads=n_heads,
                                         mxu_dtype=jnp.bfloat16)
    out_bf16 = jax.block_until_ready(out_bf16)
    assert out_bf16.shape == (B, N, d)
    assert jnp.allclose(out_bf16, ref, atol=8e-2, rtol=5e-2), "bf16 mismatch vs ref"

    print("KERNEL_OK")
</pallas_src>

<mosaic_0001>
module attributes {stable_mosaic.version = 11 : i64} {
  func.func @_mhsa_kernel(%arg0: i32, %arg1: memref<1x8x32xf32, #tpu.memory_space<vmem>>, %arg2: memref<2x16x48xf32, #tpu.memory_space<vmem>>, %arg3: memref<2x1x48xf32, #tpu.memory_space<vmem>>, %arg4: memref<1x8x32xf32, #tpu.memory_space<vmem>>) attributes {dimension_semantics = [#tpu.dimension_semantics<parallel>], iteration_bounds = array<i64: 2>, scalar_prefetch = 0 : i64, scratch_operands = 0 : i64, tpu.core_type = #tpu.core_type<tc>, window_params = [{transform_indices = @transform_0, window_bounds = array<i64: 1, 8, 32>}, {pipeline_mode = #tpu.pipeline_mode<synchronous>, transform_indices = @transform_1, window_bounds = array<i64: 2, 16, 48>}, {pipeline_mode = #tpu.pipeline_mode<synchronous>, transform_indices = @transform_2, window_bounds = array<i64: 2, 1, 48>}, {transform_indices = @transform_3, window_bounds = array<i64: 1, 8, 32>}]} {
    %c0 = arith.constant 0 : index
    %c0_0 = arith.constant 0 : index
    %c0_1 = arith.constant 0 : index
    %0 = vector.load %arg1[%c0, %c0_0, %c0_1] : memref<1x8x32xf32, #tpu.memory_space<vmem>>, vector<1x8x32xf32>
    %1 = vector.shape_cast %0 : vector<1x8x32xf32> to vector<8x32xf32>
    %2 = vector.extract_strided_slice %1 {offsets = [0, 0], sizes = [8, 16], strides = [1, 1]} : vector<8x32xf32> to vector<8x16xf32>
    %3 = vector.extract_strided_slice %1 {offsets = [0, 16], sizes = [8, 16], strides = [1, 1]} : vector<8x32xf32> to vector<8x16xf32>
    %4 = vector.shape_cast %2 : vector<8x16xf32> to vector<1x8x16xf32>
    %5 = vector.shape_cast %3 : vector<8x16xf32> to vector<1x8x16xf32>
    %6 = tpu.concatenate %4, %5 in 0 : vector<1x8x16xf32>, vector<1x8x16xf32> -> vector<2x8x16xf32>
    %c0_2 = arith.constant 0 : index
    %c0_3 = arith.constant 0 : index
    %c0_4 = arith.constant 0 : index
    %7 = vector.load %arg2[%c0_2, %c0_3, %c0_4] : memref<2x16x48xf32, #tpu.memory_space<vmem>>, vector<2x16x48xf32>
    %cst = arith.constant dense<0.000000e+00> : vector<2x8x48xf32>
    %8 = tpu.matmul %6, %7, %cst {dimension_numbers = #tpu.dot_dimension_numbers<[2], [1], [1], [2], [0, 0, 0, 1, 1, 2], [0], [0]>} : vector<2x8x16xf32>, vector<2x16x48xf32>, vector<2x8x48xf32> -> vector<2x8x48xf32>
    %c0_5 = arith.constant 0 : index
    %c0_6 = arith.constant 0 : index
    %c0_7 = arith.constant 0 : index
    %9 = vector.load %arg3[%c0_5, %c0_6, %c0_7] : memref<2x1x48xf32, #tpu.memory_space<vmem>>, vector<2x1x48xf32>
    %10 = vector.broadcast %9 : vector<2x1x48xf32> to vector<2x8x48xf32>
    %11 = arith.addf %8, %10 : vector<2x8x48xf32>
    %12 = vector.extract_strided_slice %11 {offsets = [0, 0, 0], sizes = [2, 8, 16], strides = [1, 1, 1]} : vector<2x8x48xf32> to vector<2x8x16xf32>
    %cst_8 = arith.constant 2.500000e-01 : f32
    %13 = vector.broadcast %cst_8 : f32 to vector<2x8x16xf32>
    %14 = arith.mulf %12, %13 : vector<2x8x16xf32>
    %15 = vector.extract_strided_slice %11 {offsets = [0, 0, 16], sizes = [2, 8, 16], strides = [1, 1, 1]} : vector<2x8x48xf32> to vector<2x8x16xf32>
    %16 = vector.extract_strided_slice %11 {offsets = [0, 0, 32], sizes = [2, 8, 16], strides = [1, 1, 1]} : vector<2x8x48xf32> to vector<2x8x16xf32>
    %cst_9 = arith.constant dense<0.000000e+00> : vector<2x8x8xf32>
    %17 = tpu.matmul %14, %15, %cst_9 {dimension_numbers = #tpu.dot_dimension_numbers<[2], [2], [1], [1], [0, 0, 0, 1, 1, 1], [0], [0]>} : vector<2x8x16xf32>, vector<2x8x16xf32>, vector<2x8x8xf32> -> vector<2x8x8xf32>
    %cst_10 = arith.constant dense<0xFF800000> : vector<2x8xf32>
    %18 = vector.multi_reduction <maximumf>, %17, %cst_10 [2] : vector<2x8x8xf32> to vector<2x8xf32>
    %19 = vector.shape_cast %18 : vector<2x8xf32> to vector<2x8x1xf32>
    %20 = vector.broadcast %19 : vector<2x8x1xf32> to vector<2x8x8xf32>
    %21 = arith.subf %17, %20 : vector<2x8x8xf32>
    %22 = math.exp %21 : vector<2x8x8xf32>
    %cst_11 = arith.constant dense<0.000000e+00> : vector<2x8xf32>
    %23 = vector.multi_reduction <add>, %22, %cst_11 [2] : vector<2x8x8xf32> to vector<2x8xf32>
    %24 = vector.shape_cast %23 : vector<2x8xf32> to vector<2x8x1xf32>
    %cst_12 = arith.constant dense<0.000000e+00> : vector<2x8x16xf32>
    %25 = tpu.matmul %22, %16, %cst_12 {dimension_numbers = #tpu.dot_dimension_numbers<[2], [1], [1], [2], [0, 0, 0, 1, 1, 2], [0], [0]>} : vector<2x8x8xf32>, vector<2x8x16xf32>, vector<2x8x16xf32> -> vector<2x8x16xf32>
    %26 = tpu.reciprocal %24 {approx = true} : vector<2x8x1xf32> -> vector<2x8x1xf32>
    %27 = vector.broadcast %26 : vector<2x8x1xf32> to vector<2x8x16xf32>
    %28 = arith.mulf %25, %27 : vector<2x8x16xf32>
    %29 = vector.extract_strided_slice %28 {offsets = [0, 0, 0], sizes = [1, 8, 16], strides = [1, 1, 1]} : vector<2x8x16xf32> to vector<1x8x16xf32>
    %30 = vector.extract_strided_slice %28 {offsets = [1, 0, 0], sizes = [1, 8, 16], strides = [1, 1, 1]} : vector<2x8x16xf32> to vector<1x8x16xf32>
    %31 = tpu.concatenate %29, %30 in 2 : vector<1x8x16xf32>, vector<1x8x16xf32> -> vector<1x8x32xf32>
    %c0_13 = arith.constant 0 : index
    %c0_14 = arith.constant 0 : index
    %c0_15 = arith.constant 0 : index
    %32 = vector.load %arg4[%c0_13, %c0_14, %c0_15] : memref<1x8x32xf32, #tpu.memory_space<vmem>>, vector<1x8x32xf32>
    tpu.vector_store %arg4[%c0_13, %c0_14, %c0_15], %31 {strides = array<i32>} : memref<1x8x32xf32, #tpu.memory_space<vmem>>, vector<1x8x32xf32>,
    return
  }
  func.func @transform_0(%arg0: i32) -> (i32, i32, i32) {
    %c0_i32 = arith.constant 0 : i32
    %c0_i32_0 = arith.constant 0 : i32
    %c0_i32_1 = arith.constant 0 : i32
    return %arg0, %c0_i32, %c0_i32_0 : i32, i32, i32
  }
  func.func @transform_1(%arg0: i32) -> (i32, i32, i32) {
    %c0_i32 = arith.constant 0 : i32
    %c0_i32_0 = arith.constant 0 : i32
    %c0_i32_1 = arith.constant 0 : i32
    %c0_i32_2 = arith.constant 0 : i32
    return %c0_i32, %c0_i32_0, %c0_i32_1 : i32, i32, i32
  }
  func.func @transform_2(%arg0: i32) -> (i32, i32, i32) {
    %c0_i32 = arith.constant 0 : i32
    %c0_i32_0 = arith.constant 0 : i32
    %c0_i32_1 = arith.constant 0 : i32
    %c0_i32_2 = arith.constant 0 : i32
    return %c0_i32, %c0_i32_0, %c0_i32_1 : i32, i32, i32
  }
  func.func @transform_3(%arg0: i32) -> (i32, i32, i32) {
    %c0_i32 = arith.constant 0 : i32
    %c0_i32_0 = arith.constant 0 : i32
    %c0_i32_1 = arith.constant 0 : i32
    return %arg0, %c0_i32, %c0_i32_0 : i32, i32, i32
  }
}

</mosaic_0001>

<bundles_post_ra>
// kernel: tpu_custom_call.1
= control target key start
LH: loop header
LB: loop body
LE: loop exit
PB: predicated region body
PF: predicated region fallthrough
CT: control target
= control target key end

     0   :  { %8 = vsyncpa [#allocation3], 0  ;;  %s1289_s0 = inlined_call_operand.hbm [shape: f32[2,8,32], index: 0, kind: input, shape index: {}]   ;;  %s1290_s1 = inlined_call_operand.hbm [shape: f32[2,16,48], index: 1, kind: input, shape index: {}]   ;;  %s1291_s2 = inlined_call_operand.vmem [shape: f32[2,1,48], index: 2, kind: input, shape index: {}]   ;;  %s1292_s3 = inlined_call_operand.hbm [shape: f32[2,8,32], index: 3, kind: output, shape index: {}]  }
   0x1   :  { %10 = vsyncpa [#allocation3 + $0x1], 0 }
   0x2   :  { %11 = vsyncpa [#allocation6], 0 }
   0x3   :  { %12 = vsyncpa [#allocation4], 0 }
   0x4   :  { %14 = vsyncpa [#allocation4 + $0x1], 0  ;;  %s1100_s12 = smov 0   ;;  %s1102_s13 = smov 0  }
   0x5   :  { %s1104_s14 = smov 0   ;;  %s1106_s15 = smov 0  }
   0x6 LB: > { %s1121_s16 = sadd.s32 4294967295, %s1068_s15   ;;  %s802_s17 = sadd.s32 4294967294, %s1068_s15   ;;  %s1068_s15 = sphi %s1106_s15, %s1314_s15   ;;  %s1064_s14 = sphi %s1104_s14, %s1313_s14   ;;  %s1060_s13 = sphi %s1102_s13, %s1312_s13   ;;  %s1056_s12 = sphi %s1100_s12, %s1311_s12  }
   0x7   : > { %p40_p0 = scmp.ne.s32.totalorder %s1060_s13, %s1056_s12  ;;  %p1293_p1 = scmp.eq.s32.totalorder %s1121_s16, 0 }
   0x8   : > { %p112_p3 = scmp.eq.s32.totalorder %s802_s17, 1  ;;  %p803_p5 = scmp.ge.s32.totalorder %s1068_s15, 1 }
   0x9   : > { %p1130_p4 = por %p1293_p1, %p40_p0  ;;  %p119_p7 = scmp.lt.s32.totalorder %s1068_s15, 3 }
   0xa   : > { %p1135_p6 = por %p112_p3, %p40_p0  ;;  %s1070_s21 = smov [#allocation5]  }
   0xb   : > { %s1297_s18 = scalar_select %p1130_p4, 1, 0 }
   0xc   : > { %s1298_s19 = scalar_select %p1135_p6, 1, 0 }
   0xd   : > { %p1140_p8 = pnand %p803_p5, %p119_p7  ;;  %s131_s22 = sshll.u32 %s1070_s21, 4  ;;  %s132_s22 = int_to_ptr.vmem [resolvable:$true] %s131_s22 }
   0xe   : > { %s1154_s24 = sadd.s32 1, %s1068_s15   ;;  %s27_s25 = sadd.s32 1, %s1064_s14 }
   0xf   : > { %s1299_s20 = scalar_select %p1140_p8, 1, 0 }
  0x10   : > { %p882_p9 = pneg %p1140_p8  ;;  %s24_s26 = ssub.s32 %s1068_s15, %s1154_s24 }
  0x11   : > { %s957_s27 = scalar_lea.vmem %s132_s22, 512  ;;  %p965_p5 = scmp.lt.s32.totalorder %s132_s22, %s132_s22 }
  0x12   : > { %p1149_p11 = pnand %p882_p9, %p1293_p1  ;;  %p958_p13 = scmp.ne.s32.totalorder %s132_s22, %s957_s27 }
  0x13   : > { %p966_p7 = scmp.lt.s32.totalorder %s957_s27, %s957_s27 }
  0x14   : > { %p948_p12 = pneg %p1149_p11 }
  0x15   : > { %p967_p10 = por %p966_p7, %p965_p5 }
  0x16   : > { %p960_p0 = pnand %p958_p13, %p948_p12 }
  0x18   : > { %p961_p3 = pneg %p960_p0 }
  0x1a   : > { %p968_p2 = pnand %p967_p10, %p961_p3 }
  0x1c   : > { %971 = shalt.err (!%p968_p2)
}
  0x1d   : > { %s1071_s28 = smov 128   ;;  %s1072_s29 = smov 8  }
  0x1e   : > { %885 = dma.hbm_to_vmem [thread:$0]  (!%p1149_p11), %s1290_s1, 512, %s132_s22, [#allocation6], %s1071_s28, %s1071_s28, %s1072_s29  }
  0x1f   : > { %p25_p9 = scmp.eq.s32.totalorder %s24_s26, 0  ;;  %p34_p12 = scmp.ne.s32.totalorder %s1064_s14, %s1060_s13 }
  0x20   : > { %p35_p10 = scmp.eq.s32.totalorder %s1068_s15, 0  ;;  %p895_p2 = scmp.lt.s32.totalorder %s1068_s15, 2 }
  0x21   : > { %s1171_s5 = scalar_select %p25_p9, %s1064_s14, %s27_s25  }
  0x22   : > { %p36_p13 = por %p35_p10, %p34_p12  ;;  %p1301_p0 = scmp.eq.s32.totalorder %s1121_s16, 1 }
  0x23   : > { %s148_s7 = sand.u32 1, %s1064_s14   ;;  %s807_s8 = sshll.u32 %s1068_s15, 7 }
  0x24   : > { %p1175_p3 = por %p1301_p0, %p34_p12  ;;  %s806_s9 = sshll.u32 %s148_s7, 3 }
  0x25   : > { %s1184_s17 = scalar_lea.hbm %s1289_s0, %s807_s8  ;;  %s152_s21 = scalar_lea.vmem [#allocation2], %s806_s9 }
  0x26   : > { %s1302_s6 = scalar_select %p1175_p3, 1, 0 }
  0x27   : > { %s159_s22 = sshll.u32 %s152_s21, 4  ;;  %p1186_p11 = pnand %p895_p2, %p36_p13  ;;  %s160_s22 = int_to_ptr.vmem [resolvable:$true] %s159_s22 }
  0x28   : > { %s149_s25 = scalar_lea.sflag [#allocation3], %s148_s7  ;;  %s972_s26 = scalar_lea.hbm %s1184_s17, 128 }
  0x29   : > { %p973_p5 = scmp.ne.s32.totalorder %s1184_s17, %s972_s26  ;;  %p974_p7 = pneg %p1186_p11 }
  0x2a   : > { %s977_s29 = scalar_lea.hbm %s1289_s0, 256  ;;  %p978_p10 = scmp.lt.s32.totalorder %s1184_s17, %s1289_s0 }
  0x2b   : > { %p975_p9 = pnand %p974_p7, %p973_p5  ;;  %p979_p2 = scmp.lt.s32.totalorder %s977_s29, %s972_s26 }
  0x2d   : > { %p976_p12 = pneg %p975_p9  ;;  %p980_p13 = por %p979_p2, %p978_p10 }
  0x2f   : > { %p981_p0 = pnand %p980_p13, %p976_p12 }
  0x31   : > { %984 = shalt.err (!%p981_p0)
}
  0x32   : > { %s985_s8 = scalar_lea.vmem %s160_s22, 128  ;;  %s1073_s7 = smov [#allocation2]  }
  0x33   : > { %p986_p1 = scmp.ne.s32.totalorder %s160_s22, %s985_s8  ;;  %s990_s9 = sshll.u32 %s1073_s7, 4  ;;  %s991_s9 = int_to_ptr.vmem [resolvable:$false] %s990_s9 }
  0x34   : > { %s992_s10 = scalar_lea.vmem %s991_s9, 256  ;;  %p993_p5 = scmp.lt.s32.totalorder %s160_s22, %s991_s9 }
  0x35   : > { %p988_p6 = pnand %p986_p1, %p974_p7  ;;  %p994_p9 = scmp.lt.s32.totalorder %s992_s10, %s985_s8 }
  0x37   : > { %p989_p3 = pneg %p988_p6  ;;  %p995_p4 = por %p994_p9, %p993_p5 }
  0x39   : > { %p996_p8 = pnand %p995_p4, %p989_p3 }
  0x3b   : > { %999 = shalt.err (!%p996_p8)
}
  0x3c   : > { %889 = dma.hbm_to_vmem [thread:$0]  (!%p1186_p11), %s1184_s17, 128, %s160_s22, %s149_s25  }
  0x3d   : > { %p1304_p12 = scmp.ne.s32.totalorder %s1299_s20, 0 }
  0x3e   : > { %s1207_s11 = sand.u32 (!%p1304_p12), 1, %s1060_s13   ;;  %p1305_p1 = scmp.ne.s32.totalorder (!%p1304_p12), %s1297_s18, 0 }
  0x3f   : > { %168 = sbr.rel (%p1304_p12) target bundleno = 1177 (0x499), region = 32  ;;  %s809_s21 = sshll.u32 (!%p1304_p12), %s1207_s11, 3 }
  0x40   : > { %s171_s26 = scalar_lea.sflag (!%p1304_p12), [#allocation3], %s1207_s11  ;;  %s174_s27 = scalar_lea.vmem (!%p1304_p12), [#allocation2], %s809_s21 }
  0x44   : > { %1043 = dma.done.wait (%p1305_p1), %s171_s26, 128  }
  0x45   : > { %1045 = vsyncadd (%p1305_p1), %s171_s26, 4294967168  ;;  %p1306_p4 = scmp.eq.s32.totalorder %s1121_s16, 0 }
  0x47   : > { %1047 = dma.done.wait (%p1306_p4), [#allocation6], 512   ;;  %p1307_p6 = pmov %p1306_p4 }
  0x48   : > { %v1074_v0 = vmov 0.0   ;;  %vm1075_vm0 = vmmov 0   ;;  %v206_v1 = vld [vmem:[#allocation5 + $0x8] sm:$0xff]  ;;  %v201_v2 = vld [vmem:[%s174_s27] sm:$0xff]  ;;  %v205_v3 = vld [vmem:[#allocation5] sm:$0xff]  ;;  %s1076_s18 = smov 112  }
  0x49   : > { %1049 = vsyncadd (%p1307_p6), [#allocation6], 4294966784  ;;  %840 = vmatprep.subr.mxu0 %v1074_v0  ;;  %844 = vmatprep.mubr.msk.f32.mxu0 %vm1075_vm0, %v1074_v0  ;;  %vm223_vm1 = vcmask 130048   ;;  %v208_v4 = vld [vmem:[#allocation5 + $0x18] sm:$0xff]  ;;  %v207_v5 = vld [vmem:[#allocation5 + $0x10] sm:$0xff]  ;;  %s1077_s25 = smov 96  }
  0x4a   : > { %847 = vmatprep.subr.mxu1 %v1074_v0  ;;  %851 = vmatprep.mubr.msk.f32.mxu1 %vm1075_vm0, %v1074_v0  ;;  %v812_v7 = vld [vmem:[%s1291_s2] ss:$0 sm:$0xff]  ;;  %v813_v11 = vld [vmem:[%s1291_s2 + $0x1] ss:$0 sm:$0xff]  ;;  %vm526_vm2 = vcmask 64512   ;;  %s1078_s28 = smov 16  }
  0x4b   : > { %841 = vmatpush3.msra.mxu0 %v206_v1  ;;  %203 = vrot.lane.b32.xlu0 %v201_v2, %s1076_s18  ;;  %s823_s29 = sshll.u32 %s1121_s16, 7  ;;  %s200_s30 = scalar_lea.vmem [#allocation7], %s809_s21  ;;  %vm706_vm3 = vcmask 261120  }
  0x4c   : > { %842 = vmatprep.subr.mxu0 %v1074_v0  ;;  %848 = vmatpush3.msra.mxu1 %v208_v4  ;;  %s722_s4 = sshll.u32 %s200_s30, 4  ;;  %s1251_s9 = scalar_lea.hbm %s1292_s3, %s823_s29  ;;  %s723_s4 = int_to_ptr.vmem [resolvable:$true] %s722_s4 }
  0x4d   : > { %843 = vmatpush3.msra.mxu0 %v205_v3  ;;  %849 = vmatprep.subr.mxu1 %v1074_v0  ;;  %s709_s10 = scalar_lea.sflag [#allocation4], %s1207_s11  ;;  %s1000_s26 = scalar_lea.vmem %s723_s4, 128 }
  0x4e   : > { %845 = vmatmul.mubr.msk.f32.vlgmr.msra.gmra.mxu0 %vm223_vm1, %v201_v2  ;;  %850 = vmatpush3.msra.mxu1 %v207_v5  ;;  %p1001_p8 = scmp.ne.s32.totalorder %s723_s4, %s1000_s26  ;;  %p1308_p3 = scmp.ne.s32.totalorder %s1302_s6, 0 }
  0x4f   : > { %854 = vmatprep.subr.mxu0 %v1074_v0  ;;  %856 = vmatprep.mubr.msk.f32.mxu0 %vm1075_vm0, %v1074_v0  ;;  %s1079_s16 = smov [#allocation7]  }
  0x50   : > { %859 = vmatprep.subr.mxu1 %v1074_v0  ;;  %p1002_p11 = pnand %p1001_p8, %p1308_p3  ;;  %s1004_s21 = sshll.u32 %s1079_s16, 4  ;;  %s1005_s21 = int_to_ptr.vmem [resolvable:$false] %s1004_s21 }
  0x51   : > { %s1006_s27 = scalar_lea.vmem %s1005_s21, 256  ;;  %p1007_p10 = scmp.lt.s32.totalorder %s723_s4, %s1005_s21 }
  0x52   : > { %p1003_p7 = pneg %p1002_p11  ;;  %p1008_p2 = scmp.lt.s32.totalorder %s1006_s27, %s1000_s26 }
  0x54   : > { %p1009_p13 = por %p1008_p2, %p1007_p10 }
  0x56   : > { %p1010_p0 = pnand %p1009_p13, %p1003_p7 }
  0xbd   : > { %v204_v6 = vpop.permute.xlu0 %203 }
  0xbe   : > { %852 = vmatmul.mubr.msk.f32.vlgmr.msra.gmra.mxu1 %vm223_vm1, %v204_v6 }
  0xbf   : > { %861 = vmatprep.mubr.msk.f32.mxu1 %vm1075_vm0, %v1074_v0 }
 0x10e   : > { %v292_v8 = vpop.f32.mrf.mxu0 }
 0x10f   : > { %v293_v9 = vadd.f32 %v812_v7, %v292_v8 }
 0x110   : > { %v846_v10 = vpop.f32.mrf.mxu0 }
 0x111   : > { %371 = vrot.lane.b32.xlu1 %v293_v9, %s1076_s18  ;;  %v368_v15 = vmul.f32 0.25, %v293_v9 }
 0x17e   : > { %v364_v12 = vpop.f32.mrf.mxu1 }
 0x17f   : > { %v365_v13 = vadd.f32 %v813_v11, %v364_v12 }
 0x180   : > { %v853_v14 = vpop.f32.mrf.mxu1 }
 0x181   : > { %449 = vrot.lane.b32.xlu0 %v365_v13, %s1076_s18  ;;  %v369_v18 = vmul.f32 0.25, %v365_v13 }
 0x183   : > { %v372_v16 = vpop.permute.xlu1 %371 }
 0x184   : > { %855 = vmatpush3.xpose.msk.msra.mxu0 %vm223_vm1, %v372_v16 }
 0x185   : > { %621 = vrot.lane.b32.xlu0 %v365_v13, %s1077_s25  ;;  %864 = vmatprep.subr.mxu0 %v1074_v0 }
 0x187   : > { %857 = vmatmul.mubr.msk.f32.vlgmr.msra.gmra.mxu0 %vm223_vm1, %v368_v15 }
 0x188   : > { %866 = vmatprep.mubr.msk.f32.mxu0 %vm1075_vm0, %v1074_v0 }
 0x1f3   : > { %v450_v17 = vpop.permute.xlu0 %449 }
 0x1f4   : > { %860 = vmatpush3.xpose.msk.msra.mxu1 %vm223_vm1, %v450_v17 }
 0x1f5   : > { %869 = vmatprep.subr.mxu1 %v1074_v0 }
 0x1f7   : > { %v622_v19 = vpop.permute.xlu0 %621  ;;  %862 = vmatmul.mubr.msk.f32.vlgmr.msra.gmra.mxu1 %vm223_vm1, %v369_v18 }
 0x1f8   : > { %870 = vmatpush3.msra.mxu1 %v622_v19  ;;  %871 = vmatprep.mubr.msk.f32.mxu1 %vm1075_vm0, %v1074_v0 }
 0x247   : > { %v444_v20 = vpop.f32.mrf.mxu0 }
 0x248   : > { %v527_v21 = vsel %vm526_vm2, %v444_v20, -inf }
 0x249   : > { %528 = vmax.xlane.f32.xlu0 %v527_v21  ;;  %v858_v22 = vpop.f32.mrf.mxu0 }
 0x2b7   : > { %v522_v23 = vpop.f32.mrf.mxu1 }
 0x2b8   : > { %v530_v24 = vsel %vm526_vm2, %v522_v23, -inf }
 0x2b9   : > { %v863_v25 = vpop.f32.mrf.mxu1  ;;  %531 = vmax.xlane.f32.xlu1 %v530_v24 }
 0x2ca   : > { %545 = vrot.lane.b32.xlu1 %v293_v9, %s1077_s25 }
 0x2d2   : > { %v529_v26 = vpop.xlane.xlu0 %528 }
 0x2d3   : > { %v533_v27 = vsub.f32 %v444_v20, %v529_v26 }
 0x2d5   : > { %v535_v28 = vmul.f32 1.442695, %v533_v27 }
 0x2d7   : > { %938 = vpow2.f32 %v535_v28 }
 0x2e4   : > { %v939_v33 = vpop.eup %938 }
 0x2e5   : > { %v539_v36 = vsel %vm526_vm2, %v939_v33, 0.0 }
 0x342   : > { %v532_v29 = vpop.xlane.xlu1 %531 }
 0x343   : > { %v534_v30 = vsub.f32 %v522_v23, %v532_v29 }
 0x345   : > { %v537_v31 = vmul.f32 1.442695, %v534_v30 }
 0x346   : > { %v546_v32 = vpop.permute.xlu1 %545 }
 0x347   : > { %940 = vpow2.f32 %v537_v31  ;;  %865 = vmatpush3.msra.mxu0 %v546_v32 }
 0x348   : > { %867 = vmatmul.mubr.msk.f32.vlgmr.msra.gmra.mxu0 %vm526_vm2, %v939_v33 }
 0x354   : > { %v941_v34 = vpop.eup %940 }
 0x355   : > { %872 = vmatmul.mubr.msk.f32.vlgmr.msra.gmra.mxu1 %vm526_vm2, %v941_v34  ;;  %v542_v35 = vsel %vm526_vm2, %v941_v34, 0.0 }
 0x356   : > { %543 = vadd.xlane.f32.xlu0 %v542_v35 }
 0x35a   : > { %540 = vadd.xlane.f32.xlu0 %v539_v36 }
 0x3df   : > { %v544_v37 = vpop.xlane.xlu0 %543 }
 0x3e0   : > { %942 = vrcp.f32 %v544_v37 }
 0x3e3   : > { %v541_v44 = vpop.xlane.xlu0 %540 }
 0x3e4   : > { %944 = vrcp.f32 %v541_v44 }
 0x3ed   : > { %v943_v40 = vpop.eup %942 }
 0x3f1   : > { %v945_v45 = vpop.eup %944 }
 0x408   : > { %v617_v38 = vpop.f32.mrf.mxu0 }
 0x409   : > { %v699_v46 = vmul.f32 %v945_v45, %v617_v38 }
 0x40a   : > { %v868_v39 = vpop.f32.mrf.mxu0 }
 0x415   : > { %v693_v41 = vpop.f32.mrf.mxu1 }
 0x416   : > { %v700_v42 = vmul.f32 %v943_v40, %v693_v41 }
 0x417   : > { %v873_v43 = vpop.f32.mrf.mxu1 }
 0x418   : > { %702 = vrot.lane.b32.xlu0 %v700_v42, %s1078_s28 }
 0x48a   : > { %v703_v47 = vpop.permute.xlu0 %702 }
 0x48b   : > { %v705_v48 = vsel %vm223_vm1, %v699_v46, %v703_v47 }
 0x48c   : > { %707 = vst.msk [vmem:[%s200_s30] sm:$0xff] %vm706_vm3, %v705_v48 }
 0x48d   : > { %1013 = shalt.err (!%p1010_p0)
}
 0x48e   : > { %s1014_s18 = scalar_lea.hbm %s1251_s9, 128  ;;  %s1018_s17 = scalar_lea.hbm %s1292_s3, 256 }
 0x48f   : > { %p1015_p5 = scmp.ne.s32.totalorder %s1251_s9, %s1014_s18  ;;  %p1019_p1 = scmp.lt.s32.totalorder %s1251_s9, %s1292_s3 }
 0x490   : > { %p1020_p4 = scmp.lt.s32.totalorder %s1018_s17, %s1014_s18 }
 0x491   : > { %p1016_p9 = pnand %p1015_p5, %p1308_p3 }
 0x492   : > { %p1021_p6 = por %p1020_p4, %p1019_p1 }
 0x493   : > { %p1017_p12 = pneg %p1016_p9 }
 0x495   : > { %p1022_p8 = pnand %p1021_p6, %p1017_p12 }
 0x497   : > { %1025 = shalt.err (!%p1022_p8)
}
 0x498   : > { %880 = dma.vmem_to_hbm [thread:$0]  (%p1308_p3), %s723_s4, 128, %s1251_s9, %s709_s10  }
 0x499 PF: > { %s734_s25 = sand.u32 1, %s1056_s12   ;;  %p1309_p11 = scmp.ne.s32.totalorder %s1298_s19, 0 }
 0x49a   : > { %p1310_p7 = scmp.ge.s32.totalorder %s1068_s15, 2  ;;  %s735_s28 = scalar_lea.sflag [#allocation4], %s734_s25 }
 0x49c   : > { %p891_p10 = pnand %p1310_p7, %p1309_p11 }
 0x49e   : > { %p892_p2 = pneg %p891_p10 }
 0x4a0   : > { %1051 = dma.done.wait (%p892_p2), %s735_s28, 128  }
 0x4a1   : > { %1053 = vsyncadd (%p892_p2), %s735_s28, 4294967168  ;;  %p17_p13 = scmp.ge.s32.totalorder %s1154_s24, 4   ;;  %s1311_s12 = smov %s1060_s13 }
 0x4a2   : > { %s1312_s13 = smov %s1064_s14  ;;  %s1313_s14 = smov %s1171_s5 }
 0x4a3   : > { %s1314_s15 = smov %s1154_s24  ;;  %19 = sbr.rel (!%p17_p13) target bundleno = 6 (0x6), region = 81 }
 0x4a8   :  { %740 = vsyncpa [#allocation3], 1 }
 0x4a9   :  { %742 = vsyncpa [#allocation3 + $0x1], 1 }
 0x4aa   :  { %743 = vsyncpa [#allocation6], 1 }
 0x4ab   :  { %744 = vsyncpa [#allocation4], 1 }
 0x4ac   :  { %746 = vsyncpa [#allocation4 + $0x1], 1 }

</bundles_post_ra>
